<compile_context>
chip_gen: v7x
topology: tpu7x:2x2x1
jax: 0.10.0
libtpu: 0.0.40
codegen_flags: <defaults>
</compile_context>

<pallas_src>
import functools
import numpy as np
import jax
import jax.numpy as jnp
from jax import lax
from jax.experimental import pallas as pl
from jax.experimental.pallas import tpu as pltpu


def _ceil_to(x, m):
    return -(-x // m) * m


# -----------------------------------------------------------------------------
# Pallas kernel: fused gather + TAE attention + classification head, per tile
# -----------------------------------------------------------------------------
def _vantae_kernel(ids_ref, table_ref, topic_ref, w1_ref, b1_ref, tw_ref, o_ref,
                   *, padding_idx):
    # ids_ref:   (Bt, L)   i32   token ids for this batch tile (dense 2-D)
    # table_ref: (Vp, E)   bf16  embedding table, zero-padded V -> Vp (resident)
    # topic_ref: (Kp, E)   bf16  topic queries, zero-padded K -> Kp
    # w1_ref:    (E, Cp)   bf16  fc1 weight, zero-padded C -> Cp
    # b1_ref:    (1, Cp)   f32   fc1 bias, zero-padded
    # tw_ref:    (1, Kp)   f32   topic-mean weights (1/K for real topics, 0 pad)
    # o_ref:     (Bt, Cp)  f32   logits (lane-dense output block)
    Bt, L = ids_ref.shape
    Vp, E = table_ref.shape
    Kp = topic_ref.shape[0]

    ids = ids_ref[...]                                             # (Bt, L) i32

    # --- In-kernel embedding gather: one-hot bf16 MXU matmul -----------------
    # one_hot(ids) @ table reproduces the bf16 table rows exactly (single
    # nonzero per row, f32 accumulation).
    onehot = (ids[:, :, None] ==
              lax.broadcasted_iota(jnp.int32, (Bt, L, Vp), 2)
              ).astype(jnp.bfloat16)                               # (Bt, L, Vp)
    onehot = onehot.reshape(Bt * L, Vp)
    x = lax.dot_general(onehot, table_ref[...], (((1,), (0,)), ((), ())),
                        preferred_element_type=jnp.float32)        # (Bt*L, E)
    xb = x.astype(jnp.bfloat16)

    # --- Topic scores: one sublane/lane-dense bf16 MXU matmul ----------------
    scores = lax.dot_general(xb, topic_ref[...], (((1,), (1,)), ((), ())),
                             preferred_element_type=jnp.float32)   # (Bt*L, Kp)
    scores = scores.reshape(Bt, L, Kp)

    # --- Padding mask built in-kernel from raw ids ----------------------------
    neg = jnp.where(ids == padding_idx,
                    jnp.float32(-1e30), jnp.float32(0.0))          # (Bt, L)
    s = scores + neg[:, :, None]                                   # bcast topics

    # --- Masked softmax over the sequence axis (per row, per topic), all f32 -
    s_max = jnp.max(s, axis=1, keepdims=True)                      # (Bt, 1, Kp)
    p = jnp.exp(s - s_max)                                         # (Bt, L, Kp)
    denom = jnp.sum(p, axis=1, keepdims=True)                      # (Bt, 1, Kp)
    alpha = p * pl.reciprocal(denom, approx=True)                  # EUP divide

    # --- Topic mean folded into pooling weights (precomputed tw vector) ------
    w = jnp.sum(alpha * tw_ref[...].reshape(1, 1, Kp),
                axis=2, keepdims=True)                             # (Bt, L, 1)
    pooled = jnp.sum(w * x.reshape(Bt, L, E), axis=1)              # (Bt, E) f32
    # TODO(synk): at block_b >= 256 consider moving this pooling onto the MXU
    # (batched einsum) to relieve the VALU/XLU slots.

    # --- Classification head (bf16 MXU operands, f32 accumulation) -----------
    logits = jnp.dot(pooled.astype(jnp.bfloat16), w1_ref[...],
                     preferred_element_type=jnp.float32) + b1_ref[...]
    o_ref[...] = logits                                            # (Bt, Cp)


# -----------------------------------------------------------------------------
# Tile sizing helpers
# -----------------------------------------------------------------------------
def _step_vmem_bytes(tile, L, E, Vp, Kp, Cp):
    """Rough per-grid-step VMEM footprint (blocks + in-kernel temporaries)."""
    ids_blk = tile * L * 4 * 2                       # double-buffered input
    out_blk = tile * Cp * 4 * 2                      # double-buffered output
    resident = ((Vp * E + Kp * E + E * Cp) * 2 + (Cp + Kp) * 4) * 2
    onehot = tile * L * Vp * (4 + 2)                 # iota i32 + one-hot bf16
    emb = tile * L * E * (4 + 2)                     # gathered f32 + bf16 copy
    attn = tile * L * Kp * 4 * 3                     # scores / p / alpha (f32)
    misc = tile * (L + E + Cp) * 8
    return ids_blk + out_blk + resident + onehot + emb + attn + misc


def _choose_block_b(B, desired):
    b8 = _ceil_to(B, 8)
    n_steps = max(1, -(-b8 // max(8, desired)))
    if n_steps == 1 and b8 >= 16:
        n_steps = 2        # >= 2 "parallel" grid steps keeps both v7x TCs busy
    tile = _ceil_to(-(-b8 // n_steps), 8)
    return max(8, min(tile, b8))


# -----------------------------------------------------------------------------
# Wrapper
# -----------------------------------------------------------------------------
def vantae_forward(token_ids, emb_weight, topic_emb, fc1_w, fc1_b,
                   padding_idx=0, block_b=None):
    """Full VANTAE forward (inference).  Returns logits of shape (B, labels)."""
    B, L = token_ids.shape
    V, E = emb_weight.shape
    K = topic_emb.shape[0]
    C = fc1_w.shape[1]

    # Padded sizes for dense TPU layouts.
    Vp = _ceil_to(V, 128)          # lane-dense one-hot contraction
    Kp = _ceil_to(K, 8)            # sublane multiple for topic queries
    Cp = _ceil_to(C, 128)          # lane-dense output block (unmasked stores)

    # The in-kernel one-hot gather keeps the table VMEM-resident; only sensible
    # for small vocabularies (this model's).
    # TODO(synk): for large vocabularies fall back to an XLA gather emitting
    # bf16 embeddings (or a DMA-based in-kernel gather).
    assert Vp * E * 2 <= 8 * 1024 * 1024, \
        "vocab too large for the VMEM-resident one-hot gather path"

    table = jnp.zeros((Vp, E), jnp.bfloat16).at[:V].set(
        emb_weight.astype(jnp.bfloat16))
    topics = jnp.zeros((Kp, E), jnp.bfloat16).at[:K].set(
        topic_emb.astype(jnp.bfloat16))
    w1 = jnp.zeros((E, Cp), jnp.bfloat16).at[:, :C].set(
        fc1_w.astype(jnp.bfloat16))
    b1 = jnp.zeros((1, Cp), jnp.float32).at[0, :C].set(
        fc1_b.astype(jnp.float32))
    tw = jnp.zeros((1, Kp), jnp.float32).at[0, :K].set(1.0 / K)

    # Batch tile: up to 512 rows, >=2 parallel steps when possible, capped by
    # an explicit VMEM budget (safe on v7x's smaller 64 MiB VMEM).
    tile = _choose_block_b(B, 512 if block_b is None else block_b)
    vmem_budget = 20 * 1024 * 1024
    while tile > 8 and _step_vmem_bytes(tile, L, E, Vp, Kp, Cp) > vmem_budget:
        tile = max(8, _ceil_to(tile // 2, 8))
    Bp = _ceil_to(B, tile)

    ids = token_ids.astype(jnp.int32)
    if Bp != B:
        ids = jnp.concatenate(
            [ids, jnp.full((Bp - B, L), padding_idx, jnp.int32)], axis=0)

    kernel = functools.partial(_vantae_kernel, padding_idx=padding_idx)

    grid_spec = pltpu.PrefetchScalarGridSpec(
        num_scalar_prefetch=0,
        grid=(Bp // tile,),
        in_specs=[
            pl.BlockSpec((tile, L), lambda b: (b, 0)),     # token ids (dense 2-D)
            pl.BlockSpec((Vp, E), lambda b: (0, 0)),       # embedding table
            pl.BlockSpec((Kp, E), lambda b: (0, 0)),       # topic queries
            pl.BlockSpec((E, Cp), lambda b: (0, 0)),       # fc1 weight
            pl.BlockSpec((1, Cp), lambda b: (0, 0)),       # fc1 bias
            pl.BlockSpec((1, Kp), lambda b: (0, 0)),       # topic-mean weights
        ],
        out_specs=pl.BlockSpec((tile, Cp), lambda b: (b, 0)),   # lane-dense
    )

    cost = pl.CostEstimate(
        flops=int(2 * Bp * L * (Vp * E + E * Kp + E) + 2 * Bp * E * Cp),
        transcendentals=int(Bp * L * Kp),
        bytes_accessed=int(Bp * L * 4 + (Vp * E + Kp * E + E * Cp) * 2
                           + (Cp + Kp) * 4 + Bp * Cp * 4),
    )

    out = pl.pallas_call(
        kernel,
        out_shape=jax.ShapeDtypeStruct((Bp, Cp), jnp.float32),
        grid_spec=grid_spec,
        compiler_params=pltpu.CompilerParams(
            dimension_semantics=("parallel",),
            vmem_limit_bytes=32 * 1024 * 1024),
        cost_estimate=cost,
    )(ids, table, topics, w1, b1, tw)

    return out[:B, :C]


# -----------------------------------------------------------------------------
# Pure-JAX reference (module semantics, full f32) for correctness checking
# -----------------------------------------------------------------------------
def vantae_reference(token_ids, emb_weight, topic_emb, fc1_w, fc1_b,
                     padding_idx=0):
    emb_out = jnp.take(emb_weight, token_ids, axis=0)           # (B, L, E)
    mask = (token_ids != padding_idx)                           # (B, L)
    scores = jnp.einsum("ble,ke->blk", emb_out, topic_emb)      # (B, L, K)
    scores = jnp.where(mask[:, :, None], scores, jnp.float32(-1e30))
    alpha = jax.nn.softmax(scores, axis=1)                      # over seq
    ctx = jnp.einsum("blk,ble->bke", alpha, emb_out)            # (B, K, E)
    pooled = jnp.mean(ctx, axis=1)                              # (B, E)
    return pooled @ fc1_w + fc1_b[None, :]


# -----------------------------------------------------------------------------
# Driver
# -----------------------------------------------------------------------------
if __name__ == "__main__":
    # Small shapes consistent with the module's forward.
    B, L = 2, 16           # batch, sequence length
    V, E = 50, 32          # vocab size, emb_size
    K = 30                 # TAE topic count (TAE(30, emb_size, emb_size))
    LABELS = 8             # labels_num
    PAD = 0                # padding_idx

    key = jax.random.PRNGKey(0)
    k_tok, k_emb, k_top, k_w1, k_b1 = jax.random.split(key, 5)

    # Deterministic token ids in [1, V), with trailing padding per row.
    token_ids = jax.random.randint(k_tok, (B, L), 1, V, dtype=jnp.int32)
    pad_lens = jnp.array([4, 7], dtype=jnp.int32)               # padding tail per row
    col = jnp.arange(L)[None, :]
    token_ids = jnp.where(col < (L - pad_lens)[:, None], token_ids, PAD)

    # Deterministic parameters (synthetic init; padding row zeroed like nn.Embedding).
    emb_weight = jax.random.normal(k_emb, (V, E), jnp.float32) * 0.1
    emb_weight = emb_weight.at[PAD].set(0.0)
    topic_emb = jax.random.normal(k_top, (K, E), jnp.float32) * 0.1
    fc1_w = jax.random.normal(k_w1, (E, LABELS), jnp.float32) * 0.1
    fc1_b = jax.random.normal(k_b1, (LABELS,), jnp.float32) * 0.01

    logits = vantae_forward(token_ids, emb_weight, topic_emb, fc1_w, fc1_b, PAD)
    logits = jax.block_until_ready(logits)

    ref = vantae_reference(token_ids, emb_weight, topic_emb, fc1_w, fc1_b, PAD)
    ref = jax.block_until_ready(ref)

    assert logits.shape == (B, LABELS), logits.shape
    # Tolerance accounts for the bf16 table / topic / classifier operands and
    # the approximate (EUP) reciprocal in the softmax; accumulation and all
    # softmax / pooling elementwise math stay f32.
    np.testing.assert_allclose(np.asarray(logits), np.asarray(ref),
                               rtol=3e-2, atol=3e-3)
    print("KERNEL_OK")
</pallas_src>

<mosaic_0001>
module attributes {stable_mosaic.version = 11 : i64} {
  func.func @_vantae_kernel(%arg0: i32, %arg1: memref<8x16xi32, #tpu.memory_space<vmem>>, %arg2: memref<128x32xbf16, #tpu.memory_space<vmem>>, %arg3: memref<32x32xbf16, #tpu.memory_space<vmem>>, %arg4: memref<32x128xbf16, #tpu.memory_space<vmem>>, %arg5: memref<1x128xf32, #tpu.memory_space<vmem>>, %arg6: memref<1x32xf32, #tpu.memory_space<vmem>>, %arg7: memref<8x128xf32, #tpu.memory_space<vmem>>) attributes {dimension_semantics = [#tpu.dimension_semantics<parallel>], iteration_bounds = array<i64: 1>, scalar_prefetch = 0 : i64, scratch_operands = 0 : i64, tpu.core_type = #tpu.core_type<tc>, window_params = [{transform_indices = @transform_0, window_bounds = array<i64: 8, 16>}, {pipeline_mode = #tpu.pipeline_mode<synchronous>, transform_indices = @transform_1, window_bounds = array<i64: 128, 32>}, {pipeline_mode = #tpu.pipeline_mode<synchronous>, transform_indices = @transform_2, window_bounds = array<i64: 32, 32>}, {pipeline_mode = #tpu.pipeline_mode<synchronous>, transform_indices = @transform_3, window_bounds = array<i64: 32, 128>}, {pipeline_mode = #tpu.pipeline_mode<synchronous>, transform_indices = @transform_4, window_bounds = array<i64: 1, 128>}, {pipeline_mode = #tpu.pipeline_mode<synchronous>, transform_indices = @transform_5, window_bounds = array<i64: 1, 32>}, {transform_indices = @transform_6, window_bounds = array<i64: 8, 128>}]} {
    %c0 = arith.constant 0 : index
    %c0_0 = arith.constant 0 : index
    %0 = vector.load %arg1[%c0, %c0_0] : memref<8x16xi32, #tpu.memory_space<vmem>>, vector<8x16xi32>
    %1 = vector.shape_cast %0 : vector<8x16xi32> to vector<8x16x1xi32>
    %2 = tpu.iota {dimensions = array<i32: 2>} : vector<8x16x128xi32>
    %3 = vector.broadcast %1 : vector<8x16x1xi32> to vector<8x16x128xi32>
    %4 = arith.cmpi eq, %3, %2 : vector<8x16x128xi32>
    %5 = arith.extui %4 : vector<8x16x128xi1> to vector<8x16x128xi32>
    %6 = arith.sitofp %5 : vector<8x16x128xi32> to vector<8x16x128xf32>
    %7 = arith.truncf %6 : vector<8x16x128xf32> to vector<8x16x128xbf16>
    %8 = vector.shape_cast %7 : vector<8x16x128xbf16> to vector<128x128xbf16>
    %c0_1 = arith.constant 0 : index
    %c0_2 = arith.constant 0 : index
    %9 = vector.load %arg2[%c0_1, %c0_2] : memref<128x32xbf16, #tpu.memory_space<vmem>>, vector<128x32xbf16>
    %cst = arith.constant dense<0.000000e+00> : vector<128x32xf32>
    %10 = tpu.matmul %8, %9, %cst {dimension_numbers = #tpu.dot_dimension_numbers<[1], [0], [0], [1], [0, 0, 1, 1], [], []>} : vector<128x128xbf16>, vector<128x32xbf16>, vector<128x32xf32> -> vector<128x32xf32>
    %11 = arith.truncf %10 : vector<128x32xf32> to vector<128x32xbf16>
    %c0_3 = arith.constant 0 : index
    %c0_4 = arith.constant 0 : index
    %12 = vector.load %arg3[%c0_3, %c0_4] : memref<32x32xbf16, #tpu.memory_space<vmem>>, vector<32x32xbf16>
    %cst_5 = arith.constant dense<0.000000e+00> : vector<128x32xf32>
    %13 = tpu.matmul %11, %12, %cst_5 {dimension_numbers = #tpu.dot_dimension_numbers<[1], [1], [0], [0], [0, 0, 1, 0], [], []>} : vector<128x32xbf16>, vector<32x32xbf16>, vector<128x32xf32> -> vector<128x32xf32>
    %14 = vector.shape_cast %13 : vector<128x32xf32> to vector<8x16x32xf32>
    %c0_i32 = arith.constant 0 : i32
    %15 = vector.broadcast %c0_i32 : i32 to vector<8x16xi32>
    %16 = arith.cmpi eq, %0, %15 : vector<8x16xi32>
    %cst_6 = arith.constant -1.000000e+30 : f32
    %cst_7 = arith.constant 0.000000e+00 : f32
    %17 = vector.broadcast %cst_6 : f32 to vector<8x16xf32>
    %18 = vector.broadcast %cst_7 : f32 to vector<8x16xf32>
    %19 = arith.select %16, %17, %18 : vector<8x16xi1>, vector<8x16xf32>
    %20 = vector.shape_cast %19 : vector<8x16xf32> to vector<8x16x1xf32>
    %21 = vector.broadcast %20 : vector<8x16x1xf32> to vector<8x16x32xf32>
    %22 = arith.addf %14, %21 : vector<8x16x32xf32>
    %cst_8 = arith.constant dense<0xFF800000> : vector<8x32xf32>
    %23 = vector.multi_reduction <maximumf>, %22, %cst_8 [1] : vector<8x16x32xf32> to vector<8x32xf32>
    %24 = vector.shape_cast %23 : vector<8x32xf32> to vector<8x1x32xf32>
    %25 = vector.broadcast %24 : vector<8x1x32xf32> to vector<8x16x32xf32>
    %26 = arith.subf %22, %25 : vector<8x16x32xf32>
    %27 = math.exp %26 : vector<8x16x32xf32>
    %cst_9 = arith.constant dense<0.000000e+00> : vector<8x32xf32>
    %28 = vector.multi_reduction <add>, %27, %cst_9 [1] : vector<8x16x32xf32> to vector<8x32xf32>
    %29 = vector.shape_cast %28 : vector<8x32xf32> to vector<8x1x32xf32>
    %30 = tpu.reciprocal %29 {approx = true} : vector<8x1x32xf32> -> vector<8x1x32xf32>
    %31 = vector.broadcast %30 : vector<8x1x32xf32> to vector<8x16x32xf32>
    %32 = arith.mulf %27, %31 : vector<8x16x32xf32>
    %c0_10 = arith.constant 0 : index
    %c0_11 = arith.constant 0 : index
    %33 = vector.load %arg6[%c0_10, %c0_11] : memref<1x32xf32, #tpu.memory_space<vmem>>, vector<1x32xf32>
    %34 = vector.shape_cast %33 : vector<1x32xf32> to vector<1x1x32xf32>
    %35 = vector.broadcast %34 : vector<1x1x32xf32> to vector<8x16x32xf32>
    %36 = arith.mulf %32, %35 : vector<8x16x32xf32>
    %cst_12 = arith.constant dense<0.000000e+00> : vector<8x16xf32>
    %37 = vector.multi_reduction <add>, %36, %cst_12 [2] : vector<8x16x32xf32> to vector<8x16xf32>
    %38 = vector.shape_cast %37 : vector<8x16xf32> to vector<8x16x1xf32>
    %39 = vector.shape_cast %10 : vector<128x32xf32> to vector<8x16x32xf32>
    %40 = vector.broadcast %38 : vector<8x16x1xf32> to vector<8x16x32xf32>
    %41 = arith.mulf %40, %39 : vector<8x16x32xf32>
    %cst_13 = arith.constant dense<0.000000e+00> : vector<8x32xf32>
    %42 = vector.multi_reduction <add>, %41, %cst_13 [1] : vector<8x16x32xf32> to vector<8x32xf32>
    %43 = arith.truncf %42 : vector<8x32xf32> to vector<8x32xbf16>
    %c0_14 = arith.constant 0 : index
    %c0_15 = arith.constant 0 : index
    %44 = vector.load %arg4[%c0_14, %c0_15] : memref<32x128xbf16, #tpu.memory_space<vmem>>, vector<32x128xbf16>
    %cst_16 = arith.constant dense<0.000000e+00> : vector<8x128xf32>
    %45 = tpu.matmul %43, %44, %cst_16 {dimension_numbers = #tpu.dot_dimension_numbers<[1], [0], [0], [1], [0, 0, 1, 1], [], []>} : vector<8x32xbf16>, vector<32x128xbf16>, vector<8x128xf32> -> vector<8x128xf32>
    %c0_17 = arith.constant 0 : index
    %c0_18 = arith.constant 0 : index
    %46 = vector.load %arg5[%c0_17, %c0_18] : memref<1x128xf32, #tpu.memory_space<vmem>>, vector<1x128xf32>
    %47 = vector.broadcast %46 : vector<1x128xf32> to vector<8x128xf32>
    %48 = arith.addf %45, %47 : vector<8x128xf32>
    %c0_19 = arith.constant 0 : index
    %c0_20 = arith.constant 0 : index
    %49 = vector.load %arg7[%c0_19, %c0_20] : memref<8x128xf32, #tpu.memory_space<vmem>>, vector<8x128xf32>
    tpu.vector_store %arg7[%c0_19, %c0_20], %48 {strides = array<i32>} : memref<8x128xf32, #tpu.memory_space<vmem>>, vector<8x128xf32>,
    return
  }
  func.func @transform_0(%arg0: i32) -> (i32, i32) {
    %c0_i32 = arith.constant 0 : i32
    %c0_i32_0 = arith.constant 0 : i32
    return %arg0, %c0_i32 : i32, i32
  }
  func.func @transform_1(%arg0: i32) -> (i32, i32) {
    %c0_i32 = arith.constant 0 : i32
    %c0_i32_0 = arith.constant 0 : i32
    %c0_i32_1 = arith.constant 0 : i32
    return %c0_i32, %c0_i32_0 : i32, i32
  }
  func.func @transform_2(%arg0: i32) -> (i32, i32) {
    %c0_i32 = arith.constant 0 : i32
    %c0_i32_0 = arith.constant 0 : i32
    %c0_i32_1 = arith.constant 0 : i32
    return %c0_i32, %c0_i32_0 : i32, i32
  }
  func.func @transform_3(%arg0: i32) -> (i32, i32) {
    %c0_i32 = arith.constant 0 : i32
    %c0_i32_0 = arith.constant 0 : i32
    %c0_i32_1 = arith.constant 0 : i32
    return %c0_i32, %c0_i32_0 : i32, i32
  }
  func.func @transform_4(%arg0: i32) -> (i32, i32) {
    %c0_i32 = arith.constant 0 : i32
    %c0_i32_0 = arith.constant 0 : i32
    %c0_i32_1 = arith.constant 0 : i32
    return %c0_i32, %c0_i32_0 : i32, i32
  }
  func.func @transform_5(%arg0: i32) -> (i32, i32) {
    %c0_i32 = arith.constant 0 : i32
    %c0_i32_0 = arith.constant 0 : i32
    %c0_i32_1 = arith.constant 0 : i32
    return %c0_i32, %c0_i32_0 : i32, i32
  }
  func.func @transform_6(%arg0: i32) -> (i32, i32) {
    %c0_i32 = arith.constant 0 : i32
    %c0_i32_0 = arith.constant 0 : i32
    return %arg0, %c0_i32 : i32, i32
  }
}

</mosaic_0001>

<bundles_post_ra>
// kernel: tpu_custom_call.1
= control target key start
LH: loop header
LB: loop body
LE: loop exit
PB: predicated region body
PF: predicated region fallthrough
CT: control target
= control target key end

     0   :  { %v26_v0 = vlaneseq  ;;  %s1761_s0 = inlined_call_operand.vmem [shape: s32[8,16], index: 0, kind: input, shape index: {}]   ;;  %s1762_s1 = inlined_call_operand.vmem [shape: bf16[128,32], index: 1, kind: input, shape index: {}]   ;;  %s1763_s2 = inlined_call_operand.vmem [shape: bf16[32,32], index: 2, kind: input, shape index: {}]   ;;  %s1764_s3 = inlined_call_operand.vmem [shape: bf16[32,128], index: 3, kind: input, shape index: {}]   ;;  %s1765_s4 = inlined_call_operand.vmem [shape: f32[1,128], index: 4, kind: input, shape index: {}]   ;;  %s1766_s5 = inlined_call_operand.vmem [shape: f32[1,32], index: 5, kind: input, shape index: {}]   ;;  %s1767_s6 = inlined_call_operand.hbm [shape: f32[8,128], index: 6, kind: output, shape index: {}]  }
   0x1   :  { %v1234_v1 = vld [vmem:[%s1762_s1] sm:$0xff]   ;;  %v1235_v4 = vld [vmem:[%s1762_s1 + $0x8] sm:$0xff]   ;;  %v1236_v7 = vld [vmem:[%s1762_s1 + $0x10] sm:$0xff]  }
   0x2   :  { %v1363_v2 = vld [vmem:[%s1761_s0] sm:$0xff]  ;;  %v1366_v3 = vshrl.u32 %v26_v0, 7  ;;  %1168 = vmatprep.subr.bf16.mxu0 %v1234_v1  ;;  %v1237_v12 = vld [vmem:[%s1762_s1 + $0x18] sm:$0xff]  }
   0x3   :  { %1169 = vmatpush3.bf16.msra.mxu0 %v1234_v1 }
   0x4   :  { %v39_v5 = vsub.s32 1, %v1366_v3  ;;  %v28_v6 = vsub.s32 0, %v1366_v3  ;;  %1170 = vmatprep.subr.bf16.mxu0 %v1235_v4  ;;  %v50_v10 = vsub.s32 2, %v1366_v3  ;;  %v61_v11 = vsub.s32 3, %v1366_v3 }
   0x6   :  { %v40_v8 = vrot.slane %v1363_v2, %v39_v5  ;;  %v29_v9 = vrot.slane %v1363_v2, %v28_v6  ;;  %v51_v13 = vrot.slane %v1363_v2, %v50_v10 }
   0x7   :  { %1171 = vmatpush3.bf16.msra.mxu0 %v1235_v4 }
   0x8   :  { %42 = vbcast.lane.b32.xlu1 %v40_v8, 256  ;;  %31 = vbcast.lane.b32.xlu0 %v29_v9, 256 }
   0x9   :  { %1172 = vmatprep.subr.bf16.mxu0 %v1236_v7 }
   0xc   :  { %46 = vbcast.lane.b32.xlu1 %v40_v8, 264  ;;  %35 = vbcast.lane.b32.xlu0 %v29_v9, 264 }
   0xd   :  { %11 = vsyncpa [#allocation3], 0  ;;  %1173 = vmatpush3.bf16.msra.mxu0 %v1236_v7  ;;  %v1238_v14 = vld [vmem:[%s1762_s1 + $0x20] sm:$0xff]   ;;  %v62_v15 = vrot.slane %v1363_v2, %v61_v11  ;;  %v72_v16 = vsub.s32 4, %v1366_v3  ;;  %v1239_v17 = vld [vmem:[%s1762_s1 + $0x28] sm:$0xff]   ;;  %v83_v19 = vsub.s32 5, %v1366_v3 }
   0xe   :  { %1174 = vmatprep.subr.bf16.mxu0 %v1237_v12  ;;  %v1240_v20 = vld [vmem:[%s1762_s1 + $0x30] sm:$0xff]   ;;  %v94_v22 = vsub.s32 6, %v1366_v3  ;;  %v1241_v23 = vld [vmem:[%s1762_s1 + $0x38] sm:$0xff]   ;;  %v1242_v24 = vld [vmem:[%s1763_s2] sm:$0xff]   ;;  %vm355_vm0 = vcmask 261120   ;;  %v105_v27 = vsub.s32 7, %v1366_v3 }
   0xf   :  { %v73_v18 = vrot.slane %v1363_v2, %v72_v16  ;;  %v84_v21 = vrot.slane %v1363_v2, %v83_v19  ;;  %v1420_v25 = vld [vmem:[%s1763_s2 + $0x8] sm:$0xff]   ;;  %1228 = vmatprep.subr.msk.bf16.mxu1 %vm355_vm0, %v1242_v24  ;;  %v381_v28 = vsel %vm355_vm0, %v1242_v24, 0  ;;  %v115_v32 = vand.u32 127, %v26_v0  ;;  %s1321_s22 = smov [#allocation2]  }
  0x10   :  { %57 = vbcast.lane.b32.xlu1 %v51_v13, 264  ;;  %53 = vbcast.lane.b32.xlu0 %v51_v13, 256  ;;  %v95_v26 = vrot.slane %v1363_v2, %v94_v22  ;;  %v106_v29 = vrot.slane %v1363_v2, %v105_v27  ;;  %v1318_v35 = vmov 1.0|1.0   ;;  %v384_v48 = vsel %vm355_vm0, %v1420_v25, 0  ;;  %s1076_s23 = sshll.u32 %s1321_s22, 4  ;;  %s1077_s23 = int_to_ptr.vmem [resolvable:$true] %s1076_s23 }
  0x11   :  { %1175 = vmatpush3.bf16.msra.mxu0 %v1237_v12  ;;  %1201 = vmatpush3.bf16.xpose.msra.mxu1 %v381_v28  ;;  %v1319_v49 = vmov 0.0   ;;  %s1294_s24 = scalar_lea.vmem %s1077_s23, 128  ;;  %p1299_p1 = scmp.lt.s32.totalorder %s1077_s23, %s1077_s23 }
  0x12   :  { %1176 = vmatprep.subr.bf16.mxu0 %v1238_v14  ;;  %1229 = vmatprep.subr.msk.bf16.mxu1 %vm355_vm0, %v1420_v25  ;;  %p1295_p0 = scmp.ne.s32.totalorder %s1077_s23, %s1294_s24  ;;  %p1300_p2 = scmp.lt.s32.totalorder %s1294_s24, %s1294_s24 }
  0x14   :  { %68 = vbcast.lane.b32.xlu1 %v62_v15, 264  ;;  %64 = vbcast.lane.b32.xlu0 %v62_v15, 256  ;;  %p1301_p3 = por %p1300_p2, %p1299_p1 }
  0x15   :  { %1177 = vmatpush3.bf16.msra.mxu0 %v1238_v14 }
  0x16   :  { %1178 = vmatprep.subr.bf16.mxu0 %v1239_v17  ;;  %p1302_p4 = pnand %p1301_p3, %p1295_p0 }
  0x18   :  { %79 = vbcast.lane.b32.xlu1 %v73_v18, 264  ;;  %75 = vbcast.lane.b32.xlu0 %v73_v18, 256 }
  0x19   :  { %1179 = vmatpush3.bf16.msra.mxu0 %v1239_v17  ;;  %1203 = vmatpush3.bf16.xpose.msra.mxu1 %v384_v48 }
  0x1a   :  { %1180 = vmatprep.subr.bf16.mxu0 %v1240_v20  ;;  %1220 = vmatprep.subr.bf16.mxu1 %v1319_v49 }
  0x1c   :  { %90 = vbcast.lane.b32.xlu1 %v84_v21, 264  ;;  %86 = vbcast.lane.b32.xlu0 %v84_v21, 256 }
  0x1d   :  { %1181 = vmatpush3.bf16.msra.mxu0 %v1240_v20 }
  0x1e   :  { %1182 = vmatprep.subr.bf16.mxu0 %v1241_v23 }
  0x20   :  { %101 = vbcast.lane.b32.xlu1 %v95_v26, 264  ;;  %97 = vbcast.lane.b32.xlu0 %v95_v26, 256 }
  0x21   :  { %1183 = vmatpush3.bf16.msra.mxu0 %v1241_v23 }
  0x24   :  { %112 = vbcast.lane.b32.xlu1 %v106_v29, 264  ;;  %108 = vbcast.lane.b32.xlu0 %v106_v29, 256 }
  0x7a   :  { %v43_v30 = vpop.permute.xlu1 %42  ;;  %v32_v31 = vpop.permute.xlu0 %31 }
  0x7b   :  { %vm118_vm1 = vcmp.eq.s32.totalorder %v43_v30, %v115_v32  ;;  %vm116_vm4 = vcmp.eq.s32.totalorder %v32_v31, %v115_v32 }
  0x7e   :  { %v47_v33 = vpop.permute.xlu1 %46  ;;  %v36_v34 = vpop.permute.xlu0 %35 }
  0x7f   :  { %vm119_vm2 = vcmp.eq.s32.totalorder %v47_v33, %v115_v32  ;;  %vm117_vm3 = vcmp.eq.s32.totalorder %v36_v34, %v115_v32 }
  0x80   :  { %vm1110_vm5 = vmpackc.low %vm119_vm2, %vm118_vm1 }
  0x81   :  { %vm1108_vm6 = vmpackc.low %vm117_vm3, %vm116_vm4 }
  0x82   :  { %1184 = vmatprep.mubr.msk.bf16.mxu0 %vm1108_vm6, %v1318_v35  ;;  %v58_v36 = vpop.permute.xlu1 %57  ;;  %v54_v37 = vpop.permute.xlu0 %53 }
  0x83   :  { %1185 = vmatmul.mubr.msk.bf16.vlgmr.msra.gmra.mrb[0].mxu0 %vm1110_vm5, %v1318_v35  ;;  %vm121_vm7 = vcmp.eq.s32.totalorder %v58_v36, %v115_v32  ;;  %vm120_vm8 = vcmp.eq.s32.totalorder %v54_v37, %v115_v32 }
  0x84   :  { %vm1112_vm9 = vmpackc.low %vm121_vm7, %vm120_vm8 }
  0x85   :  { %1188 = vmatprep.mubr.msk.bf16.mxu0 %vm1112_vm9, %v1318_v35 }
  0x86   :  { %v69_v38 = vpop.permute.xlu1 %68  ;;  %v65_v39 = vpop.permute.xlu0 %64 }
  0x87   :  { %vm123_vm10 = vcmp.eq.s32.totalorder %v69_v38, %v115_v32  ;;  %vm122_vm11 = vcmp.eq.s32.totalorder %v65_v39, %v115_v32 }
  0x88   :  { %vm1114_vm12 = vmpackc.low %vm123_vm10, %vm122_vm11  ;;  %vm483_vm10 = vcmp.eq.s32.totalorder %v1363_v2, 0  ;;  %vm1320_vm11 = vmmov 0  }
  0x89   :  { %v484_v50 = vsel %vm483_vm10, -1e+30, %v1319_v49 }
  0x8a   :  { %v80_v40 = vpop.permute.xlu1 %79  ;;  %v76_v41 = vpop.permute.xlu0 %75  ;;  %v488_v51 = vrot.slane %v484_v50, %v28_v6  ;;  %v499_v52 = vrot.slane %v484_v50, %v39_v5  ;;  %v510_v53 = vrot.slane %v484_v50, %v50_v10  ;;  %v521_v54 = vrot.slane %v484_v50, %v61_v11 }
  0x8b   :  { %1189 = vmatmul.mubr.msk.bf16.gmra.mrb[4].mxu0 %vm1114_vm12, %v1318_v35  ;;  %vm125_vm13 = vcmp.eq.s32.totalorder %v80_v40, %v115_v32  ;;  %vm124_vm14 = vcmp.eq.s32.totalorder %v76_v41, %v115_v32  ;;  %v532_v55 = vrot.slane %v484_v50, %v72_v16  ;;  %v543_v56 = vrot.slane %v484_v50, %v83_v19 }
  0x8c   :  { %vm1116_vm15 = vmpackc.low %vm125_vm13, %vm124_vm14  ;;  %490 = vbcast.lane.b32.xlu0 %v488_v51, 256  ;;  %494 = vbcast.lane.b32.xlu1 %v488_v51, 264  ;;  %v554_v57 = vrot.slane %v484_v50, %v94_v22  ;;  %v565_v58 = vrot.slane %v484_v50, %v105_v27  ;;  %vm999_vm12 = vcmask 1041409   ;;  %vm1001_vm13 = vcmask 1042434  }
  0x8d   :  { %1192 = vmatprep.mubr.msk.bf16.mxu0 %vm1116_vm15, %v1318_v35  ;;  %vm1003_vm14 = vcmask 1043459   ;;  %vm1005_vm15 = vcmask 1044484  }
  0x8e   :  { %v91_v42 = vpop.permute.xlu1 %90  ;;  %v87_v43 = vpop.permute.xlu0 %86 }
  0x8f   :  { %vm127_vm1 = vcmp.eq.s32.totalorder %v91_v42, %v115_v32  ;;  %vm126_vm2 = vcmp.eq.s32.totalorder %v87_v43, %v115_v32 }
  0x90   :  { %vm1118_vm3 = vmpackc.low %vm127_vm1, %vm126_vm2  ;;  %501 = vbcast.lane.b32.xlu0 %v499_v52, 256  ;;  %505 = vbcast.lane.b32.xlu1 %v499_v52, 264  ;;  %vm1007_vm1 = vcmask 1045509   ;;  %vm1009_vm2 = vcmask 1046534  }
  0x92   :  { %v102_v44 = vpop.permute.xlu1 %101  ;;  %v98_v45 = vpop.permute.xlu0 %97 }
  0x93   :  { %1193 = vmatmul.mubr.msk.bf16.gmra.mrb[8].mxu0 %vm1118_vm3, %v1318_v35  ;;  %vm129_vm4 = vcmp.eq.s32.totalorder %v102_v44, %v115_v32  ;;  %vm128_vm5 = vcmp.eq.s32.totalorder %v98_v45, %v115_v32  ;;  %vm1011_vm3 = vcmask 1047559  }
  0x94   :  { %vm1120_vm6 = vmpackc.low %vm129_vm4, %vm128_vm5  ;;  %512 = vbcast.lane.b32.xlu0 %v510_v53, 256  ;;  %516 = vbcast.lane.b32.xlu1 %v510_v53, 264 }
  0x95   :  { %1196 = vmatprep.mubr.msk.bf16.mxu0 %vm1120_vm6, %v1318_v35 }
  0x96   :  { %v113_v46 = vpop.permute.xlu1 %112  ;;  %v109_v47 = vpop.permute.xlu0 %108 }
  0x97   :  { %vm131_vm7 = vcmp.eq.s32.totalorder %v113_v46, %v115_v32  ;;  %vm130_vm8 = vcmp.eq.s32.totalorder %v109_v47, %v115_v32 }
  0x98   :  { %vm1122_vm9 = vmpackc.low %vm131_vm7, %vm130_vm8  ;;  %523 = vbcast.lane.b32.xlu0 %v521_v54, 256  ;;  %527 = vbcast.lane.b32.xlu1 %v521_v54, 264 }
  0x9b   :  { %1197 = vmatmul.mubr.msk.bf16.gmra.mrb[12].mxu0 %vm1122_vm9, %v1318_v35 }
  0x9c   :  { %534 = vbcast.lane.b32.xlu0 %v532_v55, 256  ;;  %538 = vbcast.lane.b32.xlu1 %v532_v55, 264 }
  0xa0   :  { %545 = vbcast.lane.b32.xlu0 %v543_v56, 256  ;;  %549 = vbcast.lane.b32.xlu1 %v543_v56, 264 }
  0xa4   :  { %556 = vbcast.lane.b32.xlu0 %v554_v57, 256  ;;  %560 = vbcast.lane.b32.xlu1 %v554_v57, 264 }
  0xa8   :  { %567 = vbcast.lane.b32.xlu0 %v565_v58, 256  ;;  %571 = vbcast.lane.b32.xlu1 %v565_v58, 264 }
  0xfe   :  { %v491_v19 = vpop.permute.xlu0 %490  ;;  %v495_v20 = vpop.permute.xlu1 %494 }
 0x102   :  { %v502_v21 = vpop.permute.xlu0 %501  ;;  %v506_v22 = vpop.permute.xlu1 %505 }
 0x106   :  { %v513_v23 = vpop.permute.xlu0 %512  ;;  %v517_v24 = vpop.permute.xlu1 %516 }
 0x10a   :  { %v524_v25 = vpop.permute.xlu0 %523  ;;  %v528_v31 = vpop.permute.xlu1 %527 }
 0x10e   :  { %v535_v35 = vpop.permute.xlu0 %534  ;;  %v539_v44 = vpop.permute.xlu1 %538 }
 0x112   :  { %v546_v52 = vpop.permute.xlu0 %545 }
 0x156   :  { %v1455_v59 = vpop.f32.mrb[0].mxu0 }
 0x157   :  { %v1457_v60 = vpop.f32.mrb[1].mxu0 }
 0x158   :  { %v1459_v61 = vpop.f32.mrb[2].mxu0 }
 0x159   :  { %v334_v62 = vpack.c.bf16 %v1459_v61, %v1455_v59  ;;  %v1463_v63 = vpop.f32.mrb[3].mxu0 }
 0x15a   :  { %v333_v0 = vpack.c.bf16 %v1463_v63, %v1457_v60 }
 0x15c   :  { %1204 = vmatprep.mubr.msk.bf16.mxu1 %vm355_vm0, %v333_v0 }
 0x15d   :  { %1205 = vmatmul.mubr.msk.bf16.vlgmr.msra.gmra.mrb[0].mxu1 %vm355_vm0, %v334_v62 }
 0x15e   :  { %v1469_v1 = vpop.f32.mrb[4].mxu0 }
 0x15f   :  { %v1471_v2 = vpop.f32.mrb[5].mxu0 }
 0x160   :  { %v1473_v3 = vpop.f32.mrb[6].mxu0 }
 0x161   :  { %v336_v4 = vpack.c.bf16 %v1473_v3, %v1469_v1  ;;  %v1477_v5 = vpop.f32.mrb[7].mxu0 }
 0x162   :  { %v335_v6 = vpack.c.bf16 %v1477_v5, %v1471_v2 }
 0x164   :  { %1208 = vmatprep.mubr.msk.bf16.mxu1 %vm355_vm0, %v335_v6 }
 0x165   :  { %1209 = vmatmul.mubr.msk.bf16.gmra.mrb[4].mxu1 %vm355_vm0, %v336_v4 }
 0x166   :  { %v1483_v7 = vpop.f32.mrb[8].mxu0 }
 0x167   :  { %v1485_v8 = vpop.f32.mrb[9].mxu0 }
 0x168   :  { %v1487_v9 = vpop.f32.mrb[10].mxu0 }
 0x169   :  { %v338_v10 = vpack.c.bf16 %v1487_v9, %v1483_v7  ;;  %v1491_v11 = vpop.f32.mrb[11].mxu0 }
 0x16a   :  { %v337_v12 = vpack.c.bf16 %v1491_v11, %v1485_v8 }
 0x16c   :  { %1212 = vmatprep.mubr.msk.bf16.mxu1 %vm355_vm0, %v337_v12 }
 0x16d   :  { %1213 = vmatmul.mubr.msk.bf16.gmra.mrb[8].mxu1 %vm355_vm0, %v338_v10 }
 0x16e   :  { %v1497_v13 = vpop.f32.mrb[12].mxu0 }
 0x16f   :  { %v1499_v14 = vpop.f32.mrb[13].mxu0 }
 0x170   :  { %v1501_v15 = vpop.f32.mrb[14].mxu0 }
 0x171   :  { %v340_v16 = vpack.c.bf16 %v1501_v15, %v1497_v13  ;;  %v1505_v17 = vpop.f32.mrb[15].mxu0 }
 0x172   :  { %v339_v18 = vpack.c.bf16 %v1505_v17, %v1499_v14 }
 0x174   :  { %1216 = vmatprep.mubr.msk.bf16.mxu1 %vm355_vm0, %v339_v18 }
 0x175   :  { %1217 = vmatmul.mubr.msk.bf16.gmra.mrb[12].mxu1 %vm355_vm0, %v340_v16  ;;  %v550_v16 = vpop.permute.xlu1 %549 }
 0x176   :  { %1224 = vmatprep.mubr.msk.bf16.mxu1 %vm1320_vm11, %v1319_v49 }
 0x230   :  { %v1206_v26 = vpop.f32.mrb[0].mxu1 }
 0x231   :  { %v1511_v27 = vadd.f32 %v1206_v26, %v502_v21  ;;  %v420_v28 = vpop.f32.mrb[1].mxu1 }
 0x232   :  { %v1513_v29 = vadd.f32 %v491_v19, %v420_v28  ;;  %v1207_v30 = vpop.f32.mrb[2].mxu1 }
 0x233   :  { %v576_v32 = vadd.f32 %v1207_v30, %v506_v22  ;;  %v423_v33 = vpop.f32.mrb[3].mxu1  ;;  %v598_v36 = vsel %vm355_vm0, %v1511_v27, -inf }
 0x234   :  { %v1515_v34 = vadd.f32 %v495_v20, %v423_v33  ;;  %v589_v38 = vsel %vm355_vm0, %v1513_v29, -inf }
 0x235   :  { %v599_v37 = vsel %vm355_vm0, %v576_v32, -inf }
 0x236   :  { %v600_v39 = vmax.f32 %v598_v36, %v599_v37  ;;  %v590_v40 = vsel %vm355_vm0, %v1515_v34, -inf }
 0x237   :  { %v591_v41 = vmax.f32 %v589_v38, %v590_v40 }
 0x238   :  { %v601_v42 = vrot.slane %v600_v39, 4  ;;  %v1210_v43 = vpop.f32.mrb[4].mxu1 }
 0x239   :  { %v592_v45 = vrot.slane %v591_v41, 4  ;;  %v1524_v46 = vadd.f32 %v1210_v43, %v524_v25  ;;  %v436_v47 = vpop.f32.mrb[5].mxu1 }
 0x23a   :  { %v602_v48 = vmax.f32 %v600_v39, %v601_v42  ;;  %v1526_v50 = vadd.f32 %v513_v23, %v436_v47  ;;  %v1211_v51 = vpop.f32.mrb[6].mxu1  ;;  %v557_v23 = vpop.permute.xlu0 %556 }
 0x23b   :  { %v593_v53 = vmax.f32 %v591_v41, %v592_v45  ;;  %v1528_v54 = vadd.f32 %v1211_v51, %v528_v31  ;;  %v439_v55 = vpop.f32.mrb[7].mxu1  ;;  %v616_v62 = vsel %vm355_vm0, %v1524_v46, -inf  ;;  %v561_v47 = vpop.permute.xlu1 %560 }
 0x23c   :  { %v603_v56 = vrot.slane %v602_v48, 2  ;;  %v1530_v57 = vadd.f32 %v517_v24, %v439_v55  ;;  %v607_v6 = vsel %vm355_vm0, %v1526_v50, -inf }
 0x23d   :  { %v594_v58 = vrot.slane %v593_v53, 2  ;;  %v617_v0 = vsel %vm355_vm0, %v1528_v54, -inf }
 0x23e   :  { %v604_v4 = vmax.f32 %v602_v48, %v603_v56  ;;  %v618_v10 = vmax.f32 %v616_v62, %v617_v0  ;;  %v608_v12 = vsel %vm355_vm0, %v1530_v57, -inf  ;;  %v568_v62 = vpop.permute.xlu0 %567 }
 0x23f   :  { %v595_v18 = vmax.f32 %v593_v53, %v594_v58  ;;  %v609_v19 = vmax.f32 %v607_v6, %v608_v12 }
 0x240   :  { %v605_v20 = vrot.slane %v604_v4, 1  ;;  %v619_v21 = vrot.slane %v618_v10, 4  ;;  %v1214_v22 = vpop.f32.mrb[8].mxu1 }
 0x241   :  { %v596_v24 = vrot.slane %v595_v18, 1  ;;  %v610_v25 = vrot.slane %v609_v19, 4  ;;  %v1540_v26 = vadd.f32 %v1214_v22, %v546_v52  ;;  %v452_v28 = vpop.f32.mrb[9].mxu1  ;;  %v572_v22 = vpop.permute.xlu1 %571 }
 0x242   :  { %v606_v30 = vmax.f32 %v604_v4, %v605_v20  ;;  %v620_v31 = vmax.f32 %v618_v10, %v619_v21  ;;  %v1215_v33 = vpop.f32.mrb[10].mxu1  ;;  %v1542_v38 = vadd.f32 %v535_v35, %v452_v28 }
 0x243   :  { %v597_v36 = vmax.f32 %v595_v18, %v596_v24  ;;  %v611_v37 = vmax.f32 %v609_v19, %v610_v25  ;;  %v1544_v39 = vadd.f32 %v1215_v33, %v550_v16  ;;  %v455_v40 = vpop.f32.mrb[11].mxu1  ;;  %v634_v45 = vsel %vm355_vm0, %v1540_v26, -inf }
 0x244   :  { %v663_v41 = vsub.f32 %v1511_v27, %v606_v30  ;;  %v664_v42 = vsub.f32 %v576_v32, %v606_v30  ;;  %v621_v43 = vrot.slane %v620_v31, 2  ;;  %v1553_v4 = vadd.f32 %v539_v44, %v455_v40 }
 0x245   :  { %v661_v48 = vsub.f32 %v1513_v29, %v597_v36  ;;  %v662_v51 = vsub.f32 %v1515_v34, %v597_v36  ;;  %v612_v52 = vrot.slane %v611_v37, 2  ;;  %v635_v35 = vsel %vm355_vm0, %v1544_v39, -inf }
 0x246   :  { %v681_v53 = vmul.f32 1.442695, %v663_v41  ;;  %v683_v55 = vmul.f32 1.442695, %v664_v42  ;;  %v622_v56 = vmax.f32 %v620_v31, %v621_v43  ;;  %v636_v58 = vmax.f32 %v634_v45, %v635_v35 }
 0x247   :  { %v677_v27 = vmul.f32 1.442695, %v661_v48  ;;  %v679_v32 = vmul.f32 1.442695, %v662_v51  ;;  %v613_v0 = vmax.f32 %v611_v37, %v612_v52  ;;  %v625_v29 = vsel %vm355_vm0, %v1542_v38, -inf }
 0x248   :  { %1246 = vpow2.f32 %v681_v53  ;;  %v623_v6 = vrot.slane %v622_v56, 1  ;;  %v637_v34 = vrot.slane %v636_v58, 4  ;;  %v1218_v10 = vpop.f32.mrb[12].mxu1  ;;  %v626_v16 = vsel %vm355_vm0, %v1553_v4, -inf }
 0x249   :  { %1248 = vpow2.f32 %v683_v55  ;;  %v614_v12 = vrot.slane %v613_v0, 1  ;;  %v1559_v18 = vadd.f32 %v1218_v10, %v568_v62  ;;  %v468_v19 = vpop.f32.mrb[13].mxu1  ;;  %v627_v44 = vmax.f32 %v625_v29, %v626_v16 }
 0x24a   :  { %1250 = vpow2.f32 %v677_v27  ;;  %v624_v20 = vmax.f32 %v622_v56, %v623_v6  ;;  %v638_v21 = vmax.f32 %v636_v58, %v637_v34  ;;  %v1219_v24 = vpop.f32.mrb[14].mxu1  ;;  %v1567_v42 = vadd.f32 %v557_v23, %v468_v19 }
 0x24b   :  { %1252 = vpow2.f32 %v679_v32  ;;  %v615_v25 = vmax.f32 %v613_v0, %v614_v12  ;;  %v652_v28 = vsel %vm355_vm0, %v1559_v18, -inf  ;;  %v471_v30 = vpop.f32.mrb[15].mxu1  ;;  %v628_v37 = vrot.slane %v627_v44, 4 }
 0x24c   :  { %v667_v31 = vsub.f32 %v1524_v46, %v624_v20  ;;  %v668_v33 = vsub.f32 %v1528_v54, %v624_v20  ;;  %v639_v36 = vrot.slane %v638_v21, 2  ;;  %v1569_v43 = vadd.f32 %v1219_v24, %v572_v22 }
 0x24d   :  { %v665_v40 = vsub.f32 %v1526_v50, %v615_v25  ;;  %v666_v41 = vsub.f32 %v1530_v57, %v615_v25  ;;  %v629_v52 = vmax.f32 %v627_v44, %v628_v37  ;;  %v1573_v54 = vadd.f32 %v561_v47, %v471_v30 }
 0x24e   :  { %v689_v45 = vmul.f32 1.442695, %v667_v31  ;;  %v691_v48 = vmul.f32 1.442695, %v668_v33  ;;  %v640_v51 = vmax.f32 %v638_v21, %v639_v36  ;;  %v653_v46 = vsel %vm355_vm0, %v1569_v43, -inf }
 0x24f   :  { %v685_v35 = vmul.f32 1.442695, %v665_v40  ;;  %v687_v53 = vmul.f32 1.442695, %v666_v41  ;;  %v630_v50 = vrot.slane %v629_v52, 2  ;;  %v654_v56 = vmax.f32 %v652_v28, %v653_v46 }
 0x250   :  { %1254 = vpow2.f32 %v689_v45  ;;  %v641_v55 = vrot.slane %v640_v51, 1  ;;  %v643_v57 = vsel %vm355_vm0, %v1567_v42, -inf  ;;  %v644_v23 = vsel %vm355_vm0, %v1573_v54, -inf }
 0x251   :  { %1256 = vpow2.f32 %v691_v48  ;;  %v631_v27 = vmax.f32 %v629_v52, %v630_v50  ;;  %v655_v32 = vrot.slane %v654_v56, 4  ;;  %v645_v6 = vmax.f32 %v643_v57, %v644_v23 }
 0x252   :  { %v1579_v58 = vpop.eup %1246  ;;  %1258 = vpow2.f32 %v685_v35  ;;  %v642_v62 = vmax.f32 %v640_v51, %v641_v55 }
 0x253   :  { %v1581_v0 = vpop.eup %1248  ;;  %v718_v47 = vsel %vm355_vm0, %v1579_v58, 0.0  ;;  %1260 = vpow2.f32 %v687_v53  ;;  %v632_v16 = vrot.slane %v631_v27, 1  ;;  %v656_v44 = vmax.f32 %v654_v56, %v655_v32 }
 0x254   :  { %v1585_v29 = vpop.eup %1250  ;;  %v719_v34 = vsel %vm355_vm0, %v1581_v0, 0.0  ;;  %v671_v10 = vsub.f32 %v1540_v26, %v642_v62  ;;  %v672_v12 = vsub.f32 %v1544_v39, %v642_v62  ;;  %v646_v22 = vrot.slane %v645_v6, 4 }
 0x255   :  { %v1591_v19 = vpop.eup %1252  ;;  %v720_v20 = vadd.f32 %v719_v34, %v718_v47  ;;  %v709_v21 = vsel %vm355_vm0, %v1585_v29, 0.0  ;;  %v633_v30 = vmax.f32 %v631_v27, %v632_v16  ;;  %v657_v26 = vrot.slane %v656_v44, 2 }
 0x256   :  { %v710_v24 = vsel %vm355_vm0, %v1591_v19, 0.0  ;;  %v697_v25 = vmul.f32 1.442695, %v671_v10  ;;  %v699_v28 = vmul.f32 1.442695, %v672_v12  ;;  %v647_v36 = vmax.f32 %v645_v6, %v646_v22 }
 0x257   :  { %v721_v31 = vrot.slane %v720_v20, 4  ;;  %v711_v33 = vadd.f32 %v710_v24, %v709_v21  ;;  %v669_v39 = vsub.f32 %v1542_v38, %v633_v30  ;;  %v670_v37 = vsub.f32 %v1553_v4, %v633_v30 }
 0x258   :  { %1262 = vpow2.f32 %v697_v25  ;;  %v658_v45 = vmax.f32 %v656_v44, %v657_v26  ;;  %v648_v35 = vrot.slane %v647_v36, 2 }
 0x259   :  { %v722_v40 = vadd.f32 %v721_v31, %v720_v20  ;;  %v712_v41 = vrot.slane %v711_v33, 4  ;;  %1264 = vpow2.f32 %v699_v28  ;;  %v693_v51 = vmul.f32 1.442695, %v669_v39 }
 0x25a   :  { %v1599_v48 = vpop.eup %1254  ;;  %v695_v52 = vmul.f32 1.442695, %v670_v37  ;;  %v659_v56 = vrot.slane %v658_v45, 1  ;;  %v649_v57 = vmax.f32 %v647_v36, %v648_v35 }
 0x25b   :  { %v1601_v53 = vpop.eup %1256  ;;  %v723_v46 = vrot.slane %v722_v40, 2  ;;  %v713_v55 = vadd.f32 %v712_v41, %v711_v33  ;;  %v736_v50 = vsel %vm355_vm0, %v1599_v48, 0.0  ;;  %1266 = vpow2.f32 %v693_v51 }
 0x25c   :  { %v1605_v38 = vpop.eup %1258  ;;  %v737_v4 = vsel %vm355_vm0, %v1601_v53, 0.0  ;;  %1268 = vpow2.f32 %v695_v52  ;;  %v660_v6 = vmax.f32 %v658_v45, %v659_v56  ;;  %v650_v34 = vrot.slane %v649_v57, 1 }
 0x25d   :  { %v1609_v23 = vpop.eup %1260  ;;  %v714_v62 = vrot.slane %v713_v55, 2  ;;  %v738_v27 = vadd.f32 %v737_v4, %v736_v50  ;;  %v727_v32 = vsel %vm355_vm0, %v1605_v38, 0.0  ;;  %v724_v10 = vadd.f32 %v723_v46, %v722_v40 }
 0x25e   :  { %v728_v47 = vsel %vm355_vm0, %v1609_v23, 0.0  ;;  %v675_v21 = vsub.f32 %v1559_v18, %v660_v6  ;;  %v676_v44 = vsub.f32 %v1569_v43, %v660_v6  ;;  %v651_v22 = vmax.f32 %v649_v57, %v650_v34 }
 0x25f   :  { %v739_v12 = vrot.slane %v738_v27, 4  ;;  %v729_v16 = vadd.f32 %v728_v47, %v727_v32  ;;  %v715_v20 = vadd.f32 %v714_v62, %v713_v55  ;;  %v725_v24 = vrot.slane %v724_v10, 1 }
 0x260   :  { %v705_v33 = vmul.f32 1.442695, %v675_v21  ;;  %v707_v26 = vmul.f32 1.442695, %v676_v44  ;;  %v673_v36 = vsub.f32 %v1567_v42, %v651_v22  ;;  %v674_v39 = vsub.f32 %v1573_v54, %v651_v22 }
 0x261   :  { %v740_v25 = vadd.f32 %v739_v12, %v738_v27  ;;  %v730_v28 = vrot.slane %v729_v16, 4  ;;  %v716_v30 = vrot.slane %v715_v20, 1  ;;  %v726_v43 = vadd.f32 %v725_v24, %v724_v10 }
 0x262   :  { %v1617_v31 = vpop.eup %1262  ;;  %1270 = vpow2.f32 %v705_v33  ;;  %v701_v51 = vmul.f32 1.442695, %v673_v36  ;;  %v703_v52 = vmul.f32 1.442695, %v674_v39 }
 0x263   :  { %v1621_v37 = vpop.eup %1264  ;;  %v741_v40 = vrot.slane %v740_v25, 2  ;;  %v731_v41 = vadd.f32 %v730_v28, %v729_v16  ;;  %v754_v18 = vsel %vm355_vm0, %v1617_v31, 0.0  ;;  %1272 = vpow2.f32 %v707_v26 }
 0x264   :  { %v755_v45 = vsel %vm355_vm0, %v1621_v37, 0.0  ;;  %v717_v42 = vadd.f32 %v716_v30, %v715_v20  ;;  %1274 = vpow2.f32 %v701_v51 }
 0x265   :  { %v732_v35 = vrot.slane %v731_v41, 2  ;;  %v756_v46 = vadd.f32 %v755_v45, %v754_v18  ;;  %v1627_v55 = vpop.eup %1266  ;;  %v742_v54 = vadd.f32 %v741_v40, %v740_v25  ;;  %1276 = vpow2.f32 %v703_v52  ;;  %v1654_v45 = vld [vmem:[%s1766_s5] ss:$0 sm:$0xff] }
 0x266   :  { %v1629_v50 = vpop.eup %1268  ;;  %v745_v4 = vsel %vm355_vm0, %v1627_v55, 0.0  ;;  %1278 = vrcp.f32 %v726_v43 }
 0x267   :  { %v757_v56 = vrot.slane %v756_v46, 4  ;;  %v733_v57 = vadd.f32 %v732_v35, %v731_v41  ;;  %v746_v62 = vsel %vm355_vm0, %v1629_v50, 0.0  ;;  %v743_v27 = vrot.slane %v742_v54, 1 }
 0x268   :  { %v747_v47 = vadd.f32 %v746_v62, %v745_v4  ;;  %1280 = vrcp.f32 %v717_v42 }
 0x269   :  { %v758_v32 = vadd.f32 %v757_v56, %v756_v46  ;;  %v734_v6 = vrot.slane %v733_v57, 1  ;;  %v744_v34 = vadd.f32 %v743_v27, %v742_v54 }
 0x26a   :  { %v748_v12 = vrot.slane %v747_v47, 4 }
 0x26b   :  { %v759_v10 = vrot.slane %v758_v32, 2  ;;  %v735_v16 = vadd.f32 %v734_v6, %v733_v57  ;;  %1282 = vrcp.f32 %v744_v34 }
 0x26c   :  { %v749_v20 = vadd.f32 %v748_v12, %v747_v47  ;;  %v1635_v44 = vpop.eup %1270 }
 0x26d   :  { %1284 = vrcp.f32 %v735_v16  ;;  %v760_v21 = vadd.f32 %v759_v10, %v758_v32  ;;  %v1637_v22 = vpop.eup %1272  ;;  %v772_v25 = vsel %vm355_vm0, %v1635_v44, 0.0 }
 0x26e   :  { %v750_v24 = vrot.slane %v749_v20, 2  ;;  %v1641_v30 = vpop.eup %1274  ;;  %v773_v33 = vsel %vm355_vm0, %v1637_v22, 0.0 }
 0x26f   :  { %v761_v28 = vrot.slane %v760_v21, 1  ;;  %v1645_v26 = vpop.eup %1276  ;;  %v774_v36 = vadd.f32 %v773_v33, %v772_v25  ;;  %v763_v39 = vsel %vm355_vm0, %v1641_v30, 0.0 }
 0x270   :  { %v751_v41 = vadd.f32 %v750_v24, %v749_v20  ;;  %v1279_v18 = vpop.eup %1278  ;;  %v764_v43 = vsel %vm355_vm0, %v1645_v26, 0.0 }
 0x271   :  { %v762_v40 = vadd.f32 %v761_v28, %v760_v21  ;;  %v775_v52 = vrot.slane %v774_v36, 4  ;;  %v765_v35 = vadd.f32 %v764_v43, %v763_v39  ;;  %v791_v46 = vmul.f32 %v1279_v18, %v1579_v58 }
 0x272   :  { %v1281_v51 = vpop.eup %1280  ;;  %v792_v42 = vmul.f32 %v1279_v18, %v1581_v0  ;;  %v752_v4 = vrot.slane %v751_v41, 1 }
 0x273   :  { %v790_v54 = vmul.f32 %v1281_v51, %v1591_v19  ;;  %v789_v56 = vmul.f32 %v1281_v51, %v1585_v29  ;;  %1286 = vrcp.f32 %v762_v40  ;;  %v776_v57 = vadd.f32 %v775_v52, %v774_v36 }
 0x274   :  { %v766_v62 = vrot.slane %v765_v35, 4  ;;  %v814_v27 = vmul.f32 %v1654_v45, %v791_v46  ;;  %v753_v6 = vadd.f32 %v752_v4, %v751_v41  ;;  %v815_v0 = vmul.f32 %v1654_v45, %v792_v42 }
 0x275   :  { %v1283_v32 = vpop.eup %1282  ;;  %v813_v47 = vmul.f32 %v1654_v45, %v790_v54  ;;  %v777_v10 = vrot.slane %v776_v57, 2  ;;  %v812_v25 = vmul.f32 %v1654_v45, %v789_v56 }
 0x276   :  { %v767_v12 = vadd.f32 %v766_v62, %v765_v35  ;;  %v834_v58 = vsel %vm355_vm0, %v814_v27, 0.0  ;;  %v795_v19 = vmul.f32 %v1283_v32, %v1599_v48  ;;  %v796_v16 = vmul.f32 %v1283_v32, %v1601_v53 }
 0x277   :  { %v1285_v34 = vpop.eup %1284  ;;  %835 = vadd.xlane.f32.xlu0 %v834_v58  ;;  %v831_v29 = vsel %vm355_vm0, %v813_v47, 0.0  ;;  %1288 = vrcp.f32 %v753_v6  ;;  %v778_v33 = vadd.f32 %v777_v10, %v776_v57  ;;  %v837_v36 = vsel %vm355_vm0, %v815_v0, 0.0 }
 0x278   :  { %v768_v20 = vrot.slane %v767_v12, 2  ;;  %832 = vadd.xlane.f32.xlu1 %v831_v29  ;;  %v793_v21 = vmul.f32 %v1285_v34, %v1605_v38  ;;  %v794_v24 = vmul.f32 %v1285_v34, %v1609_v23  ;;  %v818_v28 = vmul.f32 %v1654_v45, %v795_v19 }
 0x279   :  { %v779_v40 = vrot.slane %v778_v33, 1  ;;  %v828_v23 = vsel %vm355_vm0, %v812_v25, 0.0  ;;  %v819_v43 = vmul.f32 %v1654_v45, %v796_v16  ;;  %v1245_v25 = vld [vmem:[%s1764_s3 + $0x8] sm:$0xff]  }
 0x27a   :  { %v769_v39 = vadd.f32 %v768_v20, %v767_v12  ;;  %v846_v48 = vsel %vm355_vm0, %v818_v28, 0.0  ;;  %v816_v53 = vmul.f32 %v1654_v45, %v793_v21  ;;  %v817_v4 = vmul.f32 %v1654_v45, %v794_v24  ;;  %v1244_v24 = vld [vmem:[%s1764_s3] sm:$0xff]  }
 0x27b   :  { %838 = vadd.xlane.f32.xlu0 %v837_v36  ;;  %v780_v18 = vadd.f32 %v779_v40, %v778_v33  ;;  %v849_v56 = vsel %vm355_vm0, %v819_v43, 0.0  ;;  %1221 = vmatpush3.bf16.msra.mxu1 %v1244_v24 }
 0x27c   :  { %847 = vadd.xlane.f32.xlu1 %v846_v48  ;;  %v770_v41 = vrot.slane %v769_v39, 1  ;;  %v840_v46 = vsel %vm355_vm0, %v816_v53, 0.0  ;;  %v843_v27 = vsel %vm355_vm0, %v817_v4, 0.0  ;;  %1222 = vmatprep.subr.bf16.mxu1 %v1319_v49 }
 0x27d   :  { %v1287_v38 = vpop.eup %1286  ;;  %1290 = vrcp.f32 %v780_v18 }
 0x27e   :  { %v799_v51 = vmul.f32 %v1287_v38, %v1617_v31  ;;  %v800_v52 = vmul.f32 %v1287_v38, %v1621_v37  ;;  %v771_v35 = vadd.f32 %v770_v41, %v769_v39 }
 0x27f   :  { %829 = vadd.xlane.f32.xlu0 %v828_v23  ;;  %1223 = vmatpush3.bf16.msra.mxu1 %v1245_v25 }
 0x280   :  { %841 = vadd.xlane.f32.xlu1 %v840_v46  ;;  %v822_v42 = vmul.f32 %v1654_v45, %v799_v51  ;;  %1292 = vrcp.f32 %v771_v35  ;;  %v823_v32 = vmul.f32 %v1654_v45, %v800_v52 }
 0x281   :  { %v1289_v54 = vpop.eup %1288 }
 0x282   :  { %v858_v57 = vsel %vm355_vm0, %v822_v42, 0.0  ;;  %v797_v31 = vmul.f32 %v1289_v54, %v1627_v55  ;;  %v798_v37 = vmul.f32 %v1289_v54, %v1629_v50  ;;  %v861_v10 = vsel %vm355_vm0, %v823_v32, 0.0 }
 0x283   :  { %850 = vadd.xlane.f32.xlu0 %v849_v56 }
 0x284   :  { %859 = vadd.xlane.f32.xlu1 %v858_v57  ;;  %v820_v62 = vmul.f32 %v1654_v45, %v797_v31  ;;  %v821_v12 = vmul.f32 %v1654_v45, %v798_v37 }
 0x286   :  { %v852_v47 = vsel %vm355_vm0, %v820_v62, 0.0  ;;  %v855_v19 = vsel %vm355_vm0, %v821_v12, 0.0 }
 0x287   :  { %844 = vadd.xlane.f32.xlu0 %v843_v27  ;;  %v1291_v6 = vpop.eup %1290 }
 0x288   :  { %853 = vadd.xlane.f32.xlu1 %v852_v47  ;;  %v803_v55 = vmul.f32 %v1291_v6, %v1635_v44  ;;  %v804_v50 = vmul.f32 %v1291_v6, %v1637_v22 }
 0x28a   :  { %v1293_v34 = vpop.eup %1292  ;;  %v826_v21 = vmul.f32 %v1654_v45, %v803_v55  ;;  %v827_v22 = vmul.f32 %v1654_v45, %v804_v50 }
 0x28b   :  { %862 = vadd.xlane.f32.xlu0 %v861_v10  ;;  %v801_v58 = vmul.f32 %v1293_v34, %v1641_v30  ;;  %v802_v0 = vmul.f32 %v1293_v34, %v1645_v26 }
 0x28c   :  { %v870_v30 = vsel %vm355_vm0, %v826_v21, 0.0  ;;  %v873_v26 = vsel %vm355_vm0, %v827_v22, 0.0 }
 0x28d   :  { %v824_v29 = vmul.f32 %v1654_v45, %v801_v58  ;;  %v825_v16 = vmul.f32 %v1654_v45, %v802_v0 }
 0x28f   :  { %856 = vadd.xlane.f32.xlu0 %v855_v19  ;;  %v864_v20 = vsel %vm355_vm0, %v824_v29, 0.0  ;;  %v867_v44 = vsel %vm355_vm0, %v825_v16, 0.0 }
 0x290   :  { %865 = vadd.xlane.f32.xlu1 %v864_v20 }
 0x293   :  { %868 = vadd.xlane.f32.xlu0 %v867_v44 }
 0x294   :  { %871 = vadd.xlane.f32.xlu1 %v870_v30 }
 0x297   :  { %874 = vadd.xlane.f32.xlu0 %v873_v26 }
 0x304   :  { %v836_v45 = vpop.xlane.xlu0 %835 }
 0x305   :  { %v833_v28 = vpop.xlane.xlu1 %832  ;;  %v878_v33 = vmul.f32 %v1455_v59, %v836_v45 }
 0x306   :  { %v877_v40 = vmul.f32 %v833_v28, %v1463_v63 }
 0x307   :  { %v901_v53 = vsel %vm355_vm0, %v878_v33, 0.0 }
 0x308   :  { %v839_v36 = vpop.xlane.xlu0 %838  ;;  %v893_v51 = vsel %vm355_vm0, %v877_v40, 0.0 }
 0x309   :  { %v879_v39 = vmul.f32 %v1459_v61, %v839_v36  ;;  %v848_v48 = vpop.xlane.xlu1 %847 }
 0x30a   :  { %v882_v59 = vmul.f32 %v1469_v1, %v848_v48 }
 0x30b   :  { %v902_v41 = vsel %vm355_vm0, %v879_v39, 0.0 }
 0x30c   :  { %v903_v38 = vadd.f32 %v902_v41, %v901_v53  ;;  %v830_v23 = vpop.xlane.xlu0 %829  ;;  %v919_v4 = vsel %vm355_vm0, %v882_v59, 0.0 }
 0x30d   :  { %v876_v18 = vmul.f32 %v830_v23, %v1457_v60  ;;  %v842_v43 = vpop.xlane.xlu1 %841 }
 0x30e   :  { %v904_v49 = vrot.slane %v903_v38, 4  ;;  %v880_v60 = vmul.f32 %v842_v43, %v1471_v2 }
 0x30f   :  { %v892_v52 = vsel %vm355_vm0, %v876_v18, 0.0 }
 0x310   :  { %v905_v61 = vadd.f32 %v904_v49, %v903_v38  ;;  %v894_v35 = vadd.f32 %v893_v51, %v892_v52  ;;  %v851_v46 = vpop.xlane.xlu0 %850 }
 0x311   :  { %v883_v42 = vmul.f32 %v1473_v3, %v851_v46  ;;  %v860_v63 = vpop.xlane.xlu1 %859  ;;  %v910_v3 = vsel %vm355_vm0, %v880_v60, 0.0 }
 0x312   :  { %v906_v54 = vrot.slane %v905_v61, 2  ;;  %v895_v56 = vrot.slane %v894_v35, 4  ;;  %v886_v34 = vmul.f32 %v1483_v7, %v860_v63 }
 0x313   :  { %v920_v57 = vsel %vm355_vm0, %v883_v42, 0.0 }
 0x314   :  { %v907_v31 = vadd.f32 %v906_v54, %v905_v61  ;;  %v896_v37 = vadd.f32 %v895_v56, %v894_v35  ;;  %v921_v62 = vadd.f32 %v920_v57, %v919_v4  ;;  %v845_v1 = vpop.xlane.xlu0 %844  ;;  %v937_v20 = vsel %vm355_vm0, %v886_v34, 0.0 }
 0x315   :  { %v881_v27 = vmul.f32 %v845_v1, %v1477_v5  ;;  %v854_v12 = vpop.xlane.xlu1 %853 }
 0x316   :  { %v908_v32 = vrot.slane %v907_v31, 1  ;;  %v897_v47 = vrot.slane %v896_v37, 2  ;;  %v922_v6 = vrot.slane %v921_v62, 4  ;;  %v884_v21 = vmul.f32 %v854_v12, %v1485_v8 }
 0x317   :  { %v911_v10 = vsel %vm355_vm0, %v881_v27, 0.0 }
 0x318   :  { %v909_v55 = vadd.f32 %v908_v32, %v907_v31  ;;  %v898_v2 = vadd.f32 %v897_v47, %v896_v37  ;;  %v923_v50 = vadd.f32 %v922_v6, %v921_v62  ;;  %v912_v58 = vadd.f32 %v911_v10, %v910_v3  ;;  %v863_v0 = vpop.xlane.xlu0 %862 }
 0x319   :  { %v887_v29 = vmul.f32 %v1487_v9, %v863_v0  ;;  %v928_v39 = vsel %vm355_vm0, %v884_v21, 0.0 }
 0x31a   :  { %v899_v19 = vrot.slane %v898_v2, 1  ;;  %v924_v16 = vrot.slane %v923_v50, 2  ;;  %v913_v5 = vrot.slane %v912_v58, 4  ;;  %v965_v7 = vpack.c.bf16 %v909_v55, %v909_v55 }
 0x31b   :  { %v938_v44 = vsel %vm355_vm0, %v887_v29, 0.0 }
 0x31c   :  { %v900_v22 = vadd.f32 %v899_v19, %v898_v2  ;;  %v925_v30 = vadd.f32 %v924_v16, %v923_v50  ;;  %v914_v26 = vadd.f32 %v913_v5, %v912_v58  ;;  %v857_v24 = vpop.xlane.xlu0 %856  ;;  %v939_v25 = vadd.f32 %v938_v44, %v937_v20 }
 0x31d   :  { %v885_v45 = vmul.f32 %v857_v24, %v1491_v11  ;;  %v866_v28 = vpop.xlane.xlu1 %865  ;;  %v992_v40 = vunpack.c.l.b16 %v965_v7 }
 0x31e   :  { %v964_v9 = vpack.c.bf16 %v900_v22, %v900_v22  ;;  %v926_v33 = vrot.slane %v925_v30, 1  ;;  %v915_v36 = vrot.slane %v914_v26, 2  ;;  %v940_v48 = vrot.slane %v939_v25, 4 }
 0x31f   :  { %v929_v8 = vsel %vm355_vm0, %v885_v45, 0.0  ;;  %v888_v53 = vmul.f32 %v866_v28, %v1499_v14 }
 0x320   :  { %v991_v41 = vunpack.c.l.b16 %v964_v9  ;;  %v916_v38 = vadd.f32 %v915_v36, %v914_v26  ;;  %v930_v23 = vadd.f32 %v929_v8, %v928_v39  ;;  %v869_v18 = vpop.xlane.xlu0 %868  ;;  %v927_v43 = vadd.f32 %v926_v33, %v925_v30  ;;  %v1135_v8 = vld [vmem:[%s1765_s4] ss:$0 sm:$0xff] }
 0x321   :  { %v941_v49 = vadd.f32 %v940_v48, %v939_v25  ;;  %v889_v11 = vmul.f32 %v869_v18, %v1505_v17  ;;  %v872_v51 = vpop.xlane.xlu1 %871  ;;  %v946_v46 = vsel %vm355_vm0, %v888_v53, 0.0 }
 0x322   :  { %v1000_v59 = vsel %vm999_vm12, %v992_v40, %v991_v41  ;;  %v917_v52 = vrot.slane %v916_v38, 1  ;;  %v931_v61 = vrot.slane %v930_v23, 4  ;;  %v890_v14 = vmul.f32 %v1497_v13, %v872_v51 }
 0x323   :  { %v942_v35 = vrot.slane %v941_v49, 2  ;;  %v947_v42 = vsel %vm355_vm0, %v889_v11, 0.0  ;;  %v967_v60 = vpack.c.bf16 %v927_v43, %v927_v43 }
 0x324   :  { %v918_v63 = vadd.f32 %v917_v52, %v916_v38  ;;  %v932_v54 = vadd.f32 %v931_v61, %v930_v23  ;;  %v948_v56 = vadd.f32 %v947_v42, %v946_v46  ;;  %v875_v4 = vpop.xlane.xlu0 %874  ;;  %v955_v27 = vsel %vm355_vm0, %v890_v14, 0.0 }
 0x325   :  { %v943_v57 = vadd.f32 %v942_v35, %v941_v49  ;;  %v891_v17 = vmul.f32 %v1501_v15, %v875_v4  ;;  %v994_v34 = vunpack.c.l.b16 %v967_v60 }
 0x326   :  { %v966_v31 = vpack.c.bf16 %v918_v63, %v918_v63  ;;  %v933_v37 = vrot.slane %v932_v54, 2  ;;  %v949_v62 = vrot.slane %v948_v56, 4 }
 0x327   :  { %v944_v1 = vrot.slane %v943_v57, 1  ;;  %v956_v32 = vsel %vm355_vm0, %v891_v17, 0.0 }
 0x328   :  { %v993_v47 = vunpack.c.l.b16 %v966_v31  ;;  %v934_v13 = vadd.f32 %v933_v37, %v932_v54  ;;  %v950_v6 = vadd.f32 %v949_v62, %v948_v56  ;;  %v957_v3 = vadd.f32 %v956_v32, %v955_v27 }
 0x329   :  { %v945_v10 = vadd.f32 %v944_v1, %v943_v57 }
 0x32a   :  { %v1002_v12 = vsel %vm1001_vm13, %v993_v47, %v1000_v59  ;;  %v935_v55 = vrot.slane %v934_v13, 1  ;;  %v951_v2 = vrot.slane %v950_v6, 2  ;;  %v958_v15 = vrot.slane %v957_v3, 4 }
 0x32b   :  { %v1004_v50 = vsel %vm1003_vm14, %v994_v34, %v1002_v12  ;;  %v969_v19 = vpack.c.bf16 %v945_v10, %v945_v10 }
 0x32c   :  { %v936_v58 = vadd.f32 %v935_v55, %v934_v13  ;;  %v952_v0 = vadd.f32 %v951_v2, %v950_v6  ;;  %v959_v29 = vadd.f32 %v958_v15, %v957_v3 }
 0x32d   :  { %v996_v22 = vunpack.c.l.b16 %v969_v19 }
 0x32e   :  { %v968_v16 = vpack.c.bf16 %v936_v58, %v936_v58  ;;  %v953_v5 = vrot.slane %v952_v0, 1  ;;  %v960_v20 = vrot.slane %v959_v29, 2 }
 0x330   :  { %v995_v21 = vunpack.c.l.b16 %v968_v16  ;;  %v954_v44 = vadd.f32 %v953_v5, %v952_v0  ;;  %v961_v7 = vadd.f32 %v960_v20, %v959_v29 }
 0x332   :  { %v1006_v30 = vsel %vm1005_vm15, %v995_v21, %v1004_v50  ;;  %v970_v26 = vpack.c.bf16 %v954_v44, %v954_v44  ;;  %v962_v24 = vrot.slane %v961_v7, 1 }
 0x333   :  { %v1008_v25 = vsel %vm1007_vm1, %v996_v22, %v1006_v30 }
 0x334   :  { %v997_v45 = vunpack.c.l.b16 %v970_v26  ;;  %v963_v28 = vadd.f32 %v962_v24, %v961_v7 }
 0x336   :  { %v1010_v9 = vsel %vm1009_vm2, %v997_v45, %v1008_v25  ;;  %v971_v33 = vpack.c.bf16 %v963_v28, %v963_v28 }
 0x338   :  { %v998_v36 = vunpack.c.l.b16 %v971_v33 }
 0x33a   :  { %v1012_v39 = vsel %vm1011_vm3, %v998_v36, %v1010_v9 }
 0x33b   :  { %v1013_v48 = vpack.c.b16 %v1012_v39, %v1012_v39 }
 0x33d   :  { %1225 = vmatmul.mubr.msk.bf16.vlgmr.msra.gmra.mrb[16].mxu1 %vm355_vm0, %v1013_v48 }
 0x410   :  { %v1063_v53 = vpop.f32.mrb[16].mxu1 }
 0x411   :  { %v1064_v40 = vadd.f32 %v1135_v8, %v1063_v53  ;;  %v1226_v41 = vpop.f32.mrb[17].mxu1 }
 0x412   :  { %v1066_v38 = vpop.f32.mrb[18].mxu1 }
 0x413   :  { %1069 = vst [vmem:[#allocation2] sm:$0xff] %v1064_v40  ;;  %v1227_v23 = vpop.f32.mrb[19].mxu1 }
 0x414   :  { %1305 = shalt.err (!%p1302_p4)
}
 0x415   :  { %s1306_s4 = scalar_lea.hbm %s1767_s6, 128 }
 0x416   :  { %p1307_p5 = scmp.ne.s32.totalorder %s1767_s6, %s1306_s4  ;;  %p1310_p6 = scmp.lt.u32.totalorder %s1306_s4, %s1767_s6 }
 0x418   :  { %p1312_p7 = pnand %p1310_p6, %p1307_p5 }
 0x41a   :  { %1315 = shalt.err (!%p1312_p7)
}
 0x41b   :  { %1079 = dma.vmem_to_hbm [thread:$0]  %s1077_s23, 128, %s1767_s6, [#allocation3]  }
 0x41c   :  { %1316 = dma.done.wait [#allocation3], 128  }
 0x41d   :  { %1317 = vsyncadd [#allocation3], 4294967168 }
 0x41e   :  { %1083 = vsyncpa [#allocation3], 1 }

</bundles_post_ra>
